<compile_context>
chip_gen: v5e
topology: v5e:2x2
jax: 0.10.0
libtpu: 0.0.40
codegen_flags: <defaults>
</compile_context>

<pallas_src>
import functools
import math

import jax
import jax.numpy as jnp
from jax.experimental import pallas as pl
from jax.experimental.pallas import tpu as pltpu

_LANES = 128
_SUBLANES = 8


def _round_up(x, m):
    return (x + m - 1) // m * m


def _pad2(w, k_to, n_to):
    k, n = w.shape
    return jnp.pad(w, ((0, k_to - k), (0, n_to - n)))


def _pad_bias(b, n_to):
    return jnp.pad(b, (0, n_to - b.shape[0])).reshape(1, n_to)


def _mosaic_params(dimension_semantics, est_vmem_bytes):
    kwargs = dict(dimension_semantics=dimension_semantics)
    # Only raise the scoped-VMEM limit when large row tiles need it; cap below
    # v7x's 64 MiB physical VMEM (v5e/v6e have 128 MiB so this is always safe).
    if est_vmem_bytes > 12 * 1024 * 1024:
        kwargs["vmem_limit_bytes"] = int(
            min(max(2 * est_vmem_bytes, 32 * 1024 * 1024), 48 * 1024 * 1024))
    return pltpu.CompilerParams(**kwargs)


def _point_tiling(p, tile_rows):
    tp = min(_round_up(max(p, 1), _SUBLANES), _round_up(tile_rows, _SUBLANES))
    grid_p = -(-p // tp)
    return tp, grid_p, grid_p * tp


def _pad_points(a, p_pad):
    p = a.shape[1]
    if p_pad == p:
        return a
    return jnp.pad(a, ((0, 0), (0, p_pad - p), (0, 0)))


# --------------------------------------------------------------------------- #
# Kernels                                                                      #
# --------------------------------------------------------------------------- #
def _hidden_chain(h, layer_refs, n_layers):
    """(ReLU -> Linear)^n, f32 accumulation; weights may be pre-cast to bf16."""
    for li in range(n_layers):
        w_ref = layer_refs[2 * li]
        b_ref = layer_refs[2 * li + 1]
        h = jnp.maximum(h, 0.0)
        h = jnp.dot(h.astype(w_ref.dtype), w_ref[...],
                    preferred_element_type=jnp.float32) + b_ref[...]
    return h


def _encoder_kernel(*refs, n_enc_extra, n_rz_extra, n_points, tile_p, z_dim,
                    mask_rows):
    """Fused encoder MLP + mean combiner + r->z MLP.

    Grid = (batch, point_tiles); the point axis is a reduction ("arbitrary").
    Per-point representations r never leave VMEM: their per-batch sum lives in
    a VMEM scratch; the tiny r->z MLP + sigma transform run in the finalize
    step on the last point tile.
    """
    i = 0
    x_ref = refs[i]; i += 1
    y_ref = refs[i]; i += 1
    w1x_ref = refs[i]; i += 1
    w1y_ref = refs[i]; i += 1
    b1_ref = refs[i]; i += 1
    enc_extra = refs[i:i + 2 * n_enc_extra]; i += 2 * n_enc_extra
    rz_w1_ref = refs[i]; i += 1
    rz_b1_ref = refs[i]; i += 1
    rz_extra = refs[i:i + 2 * n_rz_extra]; i += 2 * n_rz_extra
    o_ref = refs[i]; i += 1
    acc_ref = refs[i]

    pt = pl.program_id(1)

    @pl.when(pt == 0)
    def _init():
        acc_ref[...] = jnp.zeros_like(acc_ref)

    # Per-point encoder MLP for this tile (split-weight concat: [x;y] @ W1).
    h = (jnp.dot(x_ref[0], w1x_ref[...], preferred_element_type=jnp.float32)
         + jnp.dot(y_ref[0], w1y_ref[...], preferred_element_type=jnp.float32)
         + b1_ref[...])
    h = _hidden_chain(h, enc_extra, n_enc_extra)             # (tile_p, 128) f32

    if mask_rows:  # zero out the contribution of zero-padded point rows
        row = pt * tile_p + jax.lax.broadcasted_iota(
            jnp.int32, (tile_p, _LANES), 0)
        h = jnp.where(row < n_points, h, 0.0)

    # Broadcast the (1, 128) tile-sum into all 8 scratch rows (rows identical).
    acc_ref[...] += jnp.sum(h, axis=0, keepdims=True)

    @pl.when(pt == pl.num_programs(1) - 1)
    def _finalize():
        r_mean = acc_ref[...] * (1.0 / n_points)             # (8, 128), rows ==
        g = jnp.dot(r_mean, rz_w1_ref[...],
                    preferred_element_type=jnp.float32) + rz_b1_ref[...]
        g = _hidden_chain(g, rz_extra, n_rz_extra)           # (8, 128)
        lane = jax.lax.broadcasted_iota(jnp.int32, g.shape, 1)
        sigma = 0.1 + 0.9 / (1.0 + jnp.exp(-g))              # EUP slot
        out = jnp.where((lane >= z_dim) & (lane < 2 * z_dim), sigma, g)
        o_ref[...] = out.reshape(o_ref.shape).astype(o_ref.dtype)


def _decoder_kernel(*refs, n_extra, y_dim):
    """Fused decoder MLP with in-kernel epilogue.  z stays resident in VMEM
    (never broadcast to (b*p, z_dim) in HBM); its first-layer contribution is
    one tiny matmul per grid step added as a constant row."""
    x_ref, z_ref, w1x_ref, w1z_ref, b1_ref = refs[:5]
    extra = refs[5:5 + 2 * n_extra]
    o_ref = refs[5 + 2 * n_extra]

    z8 = jnp.broadcast_to(z_ref[0], (_SUBLANES, _LANES))     # (8, 128)
    zc = jnp.dot(z8, w1z_ref[...],
                 preferred_element_type=jnp.float32)[0:1, :] + b1_ref[...]
    h = jnp.dot(x_ref[0], w1x_ref[...],
                preferred_element_type=jnp.float32) + zc
    h = _hidden_chain(h, extra, n_extra)                     # (tile_p, 128) f32

    # Epilogue in-kernel: lanes [y_dim, 2*y_dim) hold sigma = 0.1 + 0.9*softplus.
    lane = jax.lax.broadcasted_iota(jnp.int32, h.shape, 1)
    softplus = jnp.maximum(h, 0.0) + jnp.log(1.0 + jnp.exp(-jnp.abs(h)))
    out = jnp.where((lane >= y_dim) & (lane < 2 * y_dim),
                    0.1 + 0.9 * softplus, h)
    o_ref[...] = out.reshape(o_ref.shape).astype(o_ref.dtype)


# --------------------------------------------------------------------------- #
# pallas_call wrappers                                                         #
# --------------------------------------------------------------------------- #
def _encode_to_z_params(prep, x, y, *, tile_rows=2048):
    b, p, _ = x.shape
    enc, rz, dims = prep["enc"], prep["rz"], prep["dims"]
    z_dim = dims["z_dim"]
    xkp, ykp = enc["w1x"].shape[0], enc["w1y"].shape[0]

    # Sublane-friendly feature widths -> dense per-tile input DMAs.
    x = jnp.pad(x, ((0, 0), (0, 0), (0, xkp - x.shape[-1])))
    y = jnp.pad(y, ((0, 0), (0, 0), (0, ykp - y.shape[-1])))

    tp, grid_p, p_pad = _point_tiling(p, tile_rows)
    x = _pad_points(x, p_pad)
    y = _pad_points(y, p_pad)

    operands = [x, y]
    in_specs = [pl.BlockSpec((1, tp, xkp), lambda bi, pi: (bi, pi, 0)),
                pl.BlockSpec((1, tp, ykp), lambda bi, pi: (bi, pi, 0))]

    def resident(a):
        operands.append(a)
        in_specs.append(pl.BlockSpec(a.shape, lambda bi, pi: (0, 0)))

    resident(enc["w1x"]); resident(enc["w1y"]); resident(enc["b1"])
    for w, bb in enc["hidden"]:
        resident(w); resident(bb)
    resident(rz["w1"]); resident(rz["b1"])
    for w, bb in rz["hidden"]:
        resident(w); resident(bb)

    kernel = functools.partial(
        _encoder_kernel, n_enc_extra=len(enc["hidden"]),
        n_rz_extra=len(rz["hidden"]), n_points=p, tile_p=tp, z_dim=z_dim,
        mask_rows=(p_pad != p))

    weight_bytes = sum(int(a.size) * a.dtype.itemsize for a in operands[2:])
    per_row_flops = (2 * (xkp + ykp) * _LANES
                     + len(enc["hidden"]) * 2 * _LANES * _LANES)
    flops = int(b * p_pad * per_row_flops)
    bytes_accessed = int(4 * (x.size + y.size) + weight_bytes
                         + 4 * b * _SUBLANES * _LANES)
    est_vmem = int(weight_bytes + 4 * 2 * tp * (xkp + ykp)
                   + 4 * 6 * tp * _LANES)

    out = pl.pallas_call(
        kernel,
        out_shape=jax.ShapeDtypeStruct((b, _SUBLANES, _LANES), jnp.float32),
        grid=(b, grid_p),
        in_specs=in_specs,
        out_specs=pl.BlockSpec((1, _SUBLANES, _LANES), lambda bi, pi: (bi, 0, 0)),
        scratch_shapes=[pltpu.VMEM((_SUBLANES, _LANES), jnp.float32)],
        compiler_params=_mosaic_params(("parallel", "arbitrary"), est_vmem),
        cost_estimate=pl.CostEstimate(flops=flops,
                                      transcendentals=int(b * _LANES),
                                      bytes_accessed=bytes_accessed),
    )(*operands)

    zraw = out[:, 0, :]                                      # (b, 128)
    return zraw[:, :z_dim], zraw[:, z_dim:2 * z_dim]


def _decode(prep, x, z, *, tile_rows=2048):
    b, p, _ = x.shape
    dec, dims = prep["dec"], prep["dims"]
    y_dim, z_dim = dims["y_dim"], dims["z_dim"]
    xkp = dec["w1x"].shape[0]

    x = jnp.pad(x, ((0, 0), (0, 0), (0, xkp - x.shape[-1])))
    tp, grid_p, p_pad = _point_tiling(p, tile_rows)
    x = _pad_points(x, p_pad)

    # z stays tiny & per-batch resident: (b, 1, 128); never (b*p, z_dim) in HBM.
    z3 = jnp.pad(z, ((0, 0), (0, _LANES - z.shape[-1])))[:, None, :]

    operands = [x, z3]
    in_specs = [pl.BlockSpec((1, tp, xkp), lambda bi, pi: (bi, pi, 0)),
                pl.BlockSpec((1, 1, _LANES), lambda bi, pi: (bi, 0, 0))]

    def resident(a):
        operands.append(a)
        in_specs.append(pl.BlockSpec(a.shape, lambda bi, pi: (0, 0)))

    resident(dec["w1x"]); resident(dec["w1z"]); resident(dec["b1"])
    for w, bb in dec["hidden"]:
        resident(w); resident(bb)

    kernel = functools.partial(_decoder_kernel, n_extra=len(dec["hidden"]),
                               y_dim=y_dim)

    weight_bytes = sum(int(a.size) * a.dtype.itemsize for a in operands[2:])
    per_row_flops = (2 * xkp * _LANES
                     + len(dec["hidden"]) * 2 * _LANES * _LANES)
    flops = int(b * p_pad * per_row_flops)
    bytes_accessed = int(4 * (x.size + z3.size + b * p_pad * _LANES)
                         + weight_bytes)
    est_vmem = int(weight_bytes + 4 * 2 * tp * xkp + 4 * 2 * tp * _LANES
                   + 4 * 4 * tp * _LANES)

    out = pl.pallas_call(
        kernel,
        out_shape=jax.ShapeDtypeStruct((b, p_pad, _LANES), jnp.float32),
        grid=(b, grid_p),
        in_specs=in_specs,
        out_specs=pl.BlockSpec((1, tp, _LANES), lambda bi, pi: (bi, pi, 0)),
        compiler_params=_mosaic_params(("parallel", "parallel"), est_vmem),
        cost_estimate=pl.CostEstimate(
            flops=flops, transcendentals=int(2 * b * p_pad * _LANES),
            bytes_accessed=bytes_accessed),
    )(*operands)

    y_mu = out[:, :p, :y_dim]
    y_sigma = out[:, :p, y_dim:2 * y_dim]
    return y_mu, y_sigma


# --------------------------------------------------------------------------- #
# Parameters (PyTorch nn.Linear-style init; first-layer weights stored split). #
# --------------------------------------------------------------------------- #
def _linear_init(key, fan_in, fan_out):
    kw, kb = jax.random.split(key)
    bound = 1.0 / math.sqrt(fan_in)
    w = jax.random.uniform(kw, (fan_in, fan_out), jnp.float32, -bound, bound)
    b = jax.random.uniform(kb, (fan_out,), jnp.float32, -bound, bound)
    return w, b


def init_neural_process_params(key, *, x_dim, y_dim, r_dim, z_dim,
                               enc_hidden=(32, 32), rz_hidden=(32,),
                               dec_hidden=(32, 32)):
    keys = iter(jax.random.split(key, 16))

    enc_dims = [x_dim + y_dim] + list(enc_hidden) + [r_dim]
    w1, b1 = _linear_init(next(keys), enc_dims[0], enc_dims[1])
    enc = {"w1x": w1[:x_dim], "w1y": w1[x_dim:], "b1": b1, "layers": []}
    for i in range(1, len(enc_dims) - 1):
        enc["layers"].append(_linear_init(next(keys), enc_dims[i], enc_dims[i + 1]))

    rz_dims = [r_dim] + list(rz_hidden) + [2 * z_dim]
    w1, b1 = _linear_init(next(keys), rz_dims[0], rz_dims[1])
    rz = {"w1": w1, "b1": b1, "layers": []}
    for i in range(1, len(rz_dims) - 1):
        rz["layers"].append(_linear_init(next(keys), rz_dims[i], rz_dims[i + 1]))

    dec_dims = [x_dim + z_dim] + list(dec_hidden) + [2 * y_dim]
    w1, b1 = _linear_init(next(keys), dec_dims[0], dec_dims[1])
    dec = {"w1x": w1[:x_dim], "w1z": w1[x_dim:], "b1": b1, "layers": []}
    for i in range(1, len(dec_dims) - 1):
        dec["layers"].append(_linear_init(next(keys), dec_dims[i], dec_dims[i + 1]))

    return {"enc": enc, "rz": rz, "dec": dec,
            "dims": {"x_dim": x_dim, "y_dim": y_dim, "r_dim": r_dim,
                     "z_dim": z_dim}}


def prepare_kernel_params(params, matmul_dtype=jnp.float32):
    """Pad every layer to 128 output lanes ONCE (not per call) with
    sublane-friendly first-layer K widths, and pre-cast hidden-layer weights to
    matmul_dtype.  Zero padding keeps padded lanes exactly zero through the
    ReLU->Linear chains, which the K-padded r->z / z first layers rely on."""
    d = params["dims"]
    x_dim, y_dim = d["x_dim"], d["y_dim"]
    xk = _round_up(x_dim, _SUBLANES)
    yk = _round_up(y_dim, _SUBLANES)

    def hidden_stack(layers, dtype):
        return [(_pad2(w, _LANES, _LANES).astype(dtype), _pad_bias(b, _LANES))
                for w, b in layers]

    enc, rz, dec = params["enc"], params["rz"], params["dec"]
    enc_p = {"w1x": _pad2(enc["w1x"], xk, _LANES),
             "w1y": _pad2(enc["w1y"], yk, _LANES),
             "b1": _pad_bias(enc["b1"], _LANES),
             "hidden": hidden_stack(enc["layers"], matmul_dtype)}
    # r->z MLP runs once per batch entry in the encoder finalize; keep it f32
    # (negligible cost) and K-pad to the encoder's 128 output lanes.
    rz_p = {"w1": _pad2(rz["w1"], _LANES, _LANES),
            "b1": _pad_bias(rz["b1"], _LANES),
            "hidden": hidden_stack(rz["layers"], jnp.float32)}
    dec_p = {"w1x": _pad2(dec["w1x"], xk, _LANES),
             "w1z": _pad2(dec["w1z"], _LANES, _LANES),
             "b1": _pad_bias(dec["b1"], _LANES),
             "hidden": hidden_stack(dec["layers"], matmul_dtype)}
    return {"enc": enc_p, "rz": rz_p, "dec": dec_p, "dims": dict(d)}


# --------------------------------------------------------------------------- #
# NeuralProcess forward (Pallas path).                                         #
# --------------------------------------------------------------------------- #
def neural_process_forward(prep, x_context, y_context, x_target, y_target=None,
                           *, key, training=False, training_type="VI",
                           n_repeat=1, tile_rows=2048):
    """Mirrors NeuralProcess.forward.  Normal distributions are returned as
    (mu, sigma) tuples; rsample() -> mu + sigma * N(0,1) with jax.random."""
    enc = functools.partial(_encode_to_z_params, prep, tile_rows=tile_rows)
    dist_context = enc(x_context, y_context)

    if training:
        if training_type == "VI":
            dist_target = enc(x_target, y_target)
        elif training_type == "MLE":
            dist_target = dist_context
        else:
            raise ValueError(training_type)
        mu, sigma = dist_target
        keys = jax.random.split(key, n_repeat)
        z_samples = [mu + sigma * jax.random.normal(k, mu.shape) for k in keys]
    else:
        dist_target = dist_context
        mu, sigma = dist_context
        z_samples = [mu + sigma * jax.random.normal(key, mu.shape)]

    dist_y = [_decode(prep, x_target, zs, tile_rows=tile_rows)
              for zs in z_samples]
    return dist_y, dist_context, dist_target


# --------------------------------------------------------------------------- #
# Pure-JAX reference (same math, unpadded).                                    #
# --------------------------------------------------------------------------- #
def _reference_forward(params, x_context, y_context, x_target, y_target=None,
                       *, key, training=False, training_type="VI", n_repeat=1):
    def mlp(parts, weights, bias, layers):
        h = sum(p @ w for p, w in zip(parts, weights)) + bias
        for w, b in layers:
            h = jnp.maximum(h, 0.0)
            h = h @ w + b
        return h

    def encode(x, y):
        b, p, _ = x.shape
        enc = params["enc"]
        r = mlp([x.reshape(b * p, -1), y.reshape(b * p, -1)],
                [enc["w1x"], enc["w1y"]], enc["b1"], enc["layers"])
        combined = jnp.mean(r.reshape(b, p, -1), axis=1)
        rz = params["rz"]
        zraw = mlp([combined], [rz["w1"]], rz["b1"], rz["layers"])
        z_dim = zraw.shape[-1] // 2
        return zraw[:, :z_dim], 0.1 + 0.9 * jax.nn.sigmoid(zraw[:, z_dim:])

    def decode(x, z):
        b, p, _ = x.shape
        dec = params["dec"]
        z_rep = jnp.broadcast_to(z[:, None, :], (b, p, z.shape[-1])).reshape(b * p, -1)
        out = mlp([x.reshape(b * p, -1), z_rep],
                  [dec["w1x"], dec["w1z"]], dec["b1"], dec["layers"])
        y_dim = out.shape[-1] // 2
        out = out.reshape(b, p, -1)
        return out[..., :y_dim], 0.1 + 0.9 * jax.nn.softplus(out[..., y_dim:])

    dist_context = encode(x_context, y_context)
    if training:
        dist_target = encode(x_target, y_target) if training_type == "VI" else dist_context
        mu, sigma = dist_target
        keys = jax.random.split(key, n_repeat)
        z_samples = [mu + sigma * jax.random.normal(k, mu.shape) for k in keys]
    else:
        dist_target = dist_context
        z_samples = [dist_context[0]
                     + dist_context[1] * jax.random.normal(key, dist_context[0].shape)]
    dist_y = [decode(x_target, z) for z in z_samples]
    return dist_y, dist_context, dist_target


if __name__ == "__main__":
    batch, n_context, n_target = 2, 8, 12
    x_dim, y_dim, r_dim, z_dim = 3, 2, 16, 8

    root = jax.random.PRNGKey(0)
    kxc, kyc, kxt, kyt, kp, ks = jax.random.split(root, 6)
    x_c = jax.random.normal(kxc, (batch, n_context, x_dim), jnp.float32)
    y_c = jax.random.normal(kyc, (batch, n_context, y_dim), jnp.float32)
    x_t = jax.random.normal(kxt, (batch, n_target, x_dim), jnp.float32)
    y_t = jax.random.normal(kyt, (batch, n_target, y_dim), jnp.float32)
    params = init_neural_process_params(kp, x_dim=x_dim, y_dim=y_dim,
                                        r_dim=r_dim, z_dim=z_dim)
    # Pad / (optionally) pre-cast weights ONCE, outside the forward path.
    prep_f32 = prepare_kernel_params(params)

    # Eval-mode forward (f32), checked tightly against the pure-JAX reference.
    out = neural_process_forward(prep_f32, x_c, y_c, x_t, key=ks)
    out = jax.block_until_ready(out)
    ref = _reference_forward(params, x_c, y_c, x_t, key=ks)

    dist_y, dist_ctx, dist_tgt = out
    assert dist_y[0][0].shape == (batch, n_target, y_dim)
    assert dist_y[0][1].shape == (batch, n_target, y_dim)
    assert dist_ctx[0].shape == (batch, z_dim)
    for a, b in zip(jax.tree_util.tree_leaves(out), jax.tree_util.tree_leaves(ref)):
        assert jnp.allclose(a, b, atol=1e-4, rtol=1e-4), "f32 mismatch vs reference"

    # Training-mode (VI) forward with 2 latent samples (exercises row masking:
    # n_target=12 pads to a 16-row point tile).
    out_tr = neural_process_forward(prep_f32, x_c, y_c, x_t, y_t, key=ks,
                                    training=True, training_type="VI", n_repeat=2)
    out_tr = jax.block_until_ready(out_tr)
    ref_tr = _reference_forward(params, x_c, y_c, x_t, y_t, key=ks,
                                training=True, training_type="VI", n_repeat=2)
    for a, b in zip(jax.tree_util.tree_leaves(out_tr), jax.tree_util.tree_leaves(ref_tr)):
        assert jnp.allclose(a, b, atol=1e-4, rtol=1e-4), "VI mismatch vs reference"

    # bf16 matmul operands (f32 accumulation) for the 128-wide hidden layers,
    # with weights pre-cast once in prepare_kernel_params.
    prep_bf16 = prepare_kernel_params(params, matmul_dtype=jnp.bfloat16)
    out_bf = neural_process_forward(prep_bf16, x_c, y_c, x_t, key=ks)
    out_bf = jax.block_until_ready(out_bf)
    for a, b in zip(jax.tree_util.tree_leaves(out_bf), jax.tree_util.tree_leaves(ref)):
        assert jnp.allclose(a, b, atol=1e-1, rtol=1e-1), "bf16 mismatch vs reference"

    print("KERNEL_OK")
</pallas_src>

<mosaic_0001>
module attributes {stable_mosaic.version = 11 : i64} {
  func.func @_encoder_kernel(%arg0: i32, %arg1: i32, %arg2: memref<1x8x8xf32, #tpu.memory_space<vmem>>, %arg3: memref<1x8x8xf32, #tpu.memory_space<vmem>>, %arg4: memref<8x128xf32, #tpu.memory_space<vmem>>, %arg5: memref<8x128xf32, #tpu.memory_space<vmem>>, %arg6: memref<1x128xf32, #tpu.memory_space<vmem>>, %arg7: memref<128x128xf32, #tpu.memory_space<vmem>>, %arg8: memref<1x128xf32, #tpu.memory_space<vmem>>, %arg9: memref<128x128xf32, #tpu.memory_space<vmem>>, %arg10: memref<1x128xf32, #tpu.memory_space<vmem>>, %arg11: memref<128x128xf32, #tpu.memory_space<vmem>>, %arg12: memref<1x128xf32, #tpu.memory_space<vmem>>, %arg13: memref<128x128xf32, #tpu.memory_space<vmem>>, %arg14: memref<1x128xf32, #tpu.memory_space<vmem>>, %arg15: memref<1x8x128xf32, #tpu.memory_space<vmem>>, %arg16: memref<8x128xf32, #tpu.memory_space<vmem>>) attributes {dimension_semantics = [#tpu.dimension_semantics<parallel>, #tpu.dimension_semantics<arbitrary>], iteration_bounds = array<i64: 2, 1>, scalar_prefetch = 0 : i64, scratch_operands = 1 : i64, tpu.core_type = #tpu.core_type<tc>, window_params = [{transform_indices = @transform_0, window_bounds = array<i64: 1, 8, 8>}, {transform_indices = @transform_1, window_bounds = array<i64: 1, 8, 8>}, {pipeline_mode = #tpu.pipeline_mode<synchronous>, transform_indices = @transform_2, window_bounds = array<i64: 8, 128>}, {pipeline_mode = #tpu.pipeline_mode<synchronous>, transform_indices = @transform_3, window_bounds = array<i64: 8, 128>}, {pipeline_mode = #tpu.pipeline_mode<synchronous>, transform_indices = @transform_4, window_bounds = array<i64: 1, 128>}, {pipeline_mode = #tpu.pipeline_mode<synchronous>, transform_indices = @transform_5, window_bounds = array<i64: 128, 128>}, {pipeline_mode = #tpu.pipeline_mode<synchronous>, transform_indices = @transform_6, window_bounds = array<i64: 1, 128>}, {pipeline_mode = #tpu.pipeline_mode<synchronous>, transform_indices = @transform_7, window_bounds = array<i64: 128, 128>}, {pipeline_mode = #tpu.pipeline_mode<synchronous>, transform_indices = @transform_8, window_bounds = array<i64: 1, 128>}, {pipeline_mode = #tpu.pipeline_mode<synchronous>, transform_indices = @transform_9, window_bounds = array<i64: 128, 128>}, {pipeline_mode = #tpu.pipeline_mode<synchronous>, transform_indices = @transform_10, window_bounds = array<i64: 1, 128>}, {pipeline_mode = #tpu.pipeline_mode<synchronous>, transform_indices = @transform_11, window_bounds = array<i64: 128, 128>}, {pipeline_mode = #tpu.pipeline_mode<synchronous>, transform_indices = @transform_12, window_bounds = array<i64: 1, 128>}, {transform_indices = @transform_13, window_bounds = array<i64: 1, 8, 128>}]} {
    %c0_i32 = arith.constant 0 : i32
    %0 = arith.cmpi eq, %arg1, %c0_i32 : i32
    %1 = arith.extui %0 : i1 to i32
    %c0_i32_0 = arith.constant 0 : i32
    %2 = arith.cmpi ne, %1, %c0_i32_0 : i32
    scf.if %2 {
      %cst_32 = arith.constant 0.000000e+00 : f32
      %38 = vector.broadcast %cst_32 : f32 to vector<8x128xf32>
      %c0_33 = arith.constant 0 : index
      %c0_34 = arith.constant 0 : index
      %39 = vector.load %arg16[%c0_33, %c0_34] : memref<8x128xf32, #tpu.memory_space<vmem>>, vector<8x128xf32>
      tpu.vector_store %arg16[%c0_33, %c0_34], %38 {strides = array<i32>} : memref<8x128xf32, #tpu.memory_space<vmem>>, vector<8x128xf32>,
    } else {
    }
    %c0 = arith.constant 0 : index
    %c0_1 = arith.constant 0 : index
    %c0_2 = arith.constant 0 : index
    %3 = vector.load %arg2[%c0, %c0_1, %c0_2] : memref<1x8x8xf32, #tpu.memory_space<vmem>>, vector<1x8x8xf32>
    %4 = vector.shape_cast %3 : vector<1x8x8xf32> to vector<8x8xf32>
    %c0_3 = arith.constant 0 : index
    %c0_4 = arith.constant 0 : index
    %5 = vector.load %arg4[%c0_3, %c0_4] : memref<8x128xf32, #tpu.memory_space<vmem>>, vector<8x128xf32>
    %cst = arith.constant dense<0.000000e+00> : vector<8x128xf32>
    %6 = tpu.matmul %4, %5, %cst {dimension_numbers = #tpu.dot_dimension_numbers<[1], [0], [0], [1], [0, 0, 1, 1], [], []>} : vector<8x8xf32>, vector<8x128xf32>, vector<8x128xf32> -> vector<8x128xf32>
    %c0_5 = arith.constant 0 : index
    %c0_6 = arith.constant 0 : index
    %c0_7 = arith.constant 0 : index
    %7 = vector.load %arg3[%c0_5, %c0_6, %c0_7] : memref<1x8x8xf32, #tpu.memory_space<vmem>>, vector<1x8x8xf32>
    %8 = vector.shape_cast %7 : vector<1x8x8xf32> to vector<8x8xf32>
    %c0_8 = arith.constant 0 : index
    %c0_9 = arith.constant 0 : index
    %9 = vector.load %arg5[%c0_8, %c0_9] : memref<8x128xf32, #tpu.memory_space<vmem>>, vector<8x128xf32>
    %cst_10 = arith.constant dense<0.000000e+00> : vector<8x128xf32>
    %10 = tpu.matmul %8, %9, %cst_10 {dimension_numbers = #tpu.dot_dimension_numbers<[1], [0], [0], [1], [0, 0, 1, 1], [], []>} : vector<8x8xf32>, vector<8x128xf32>, vector<8x128xf32> -> vector<8x128xf32>
    %11 = arith.addf %6, %10 : vector<8x128xf32>
    %c0_11 = arith.constant 0 : index
    %c0_12 = arith.constant 0 : index
    %12 = vector.load %arg6[%c0_11, %c0_12] : memref<1x128xf32, #tpu.memory_space<vmem>>, vector<1x128xf32>
    %13 = vector.broadcast %12 : vector<1x128xf32> to vector<8x128xf32>
    %14 = arith.addf %11, %13 : vector<8x128xf32>
    %cst_13 = arith.constant 0.000000e+00 : f32
    %15 = vector.broadcast %cst_13 : f32 to vector<8x128xf32>
    %16 = arith.maximumf %14, %15 : vector<8x128xf32>
    %c0_14 = arith.constant 0 : index
    %c0_15 = arith.constant 0 : index
    %17 = vector.load %arg7[%c0_14, %c0_15] : memref<128x128xf32, #tpu.memory_space<vmem>>, vector<128x128xf32>
    %cst_16 = arith.constant dense<0.000000e+00> : vector<8x128xf32>
    %18 = tpu.matmul %16, %17, %cst_16 {dimension_numbers = #tpu.dot_dimension_numbers<[1], [0], [0], [1], [0, 0, 1, 1], [], []>} : vector<8x128xf32>, vector<128x128xf32>, vector<8x128xf32> -> vector<8x128xf32>
    %c0_17 = arith.constant 0 : index
    %c0_18 = arith.constant 0 : index
    %19 = vector.load %arg8[%c0_17, %c0_18] : memref<1x128xf32, #tpu.memory_space<vmem>>, vector<1x128xf32>
    %20 = vector.broadcast %19 : vector<1x128xf32> to vector<8x128xf32>
    %21 = arith.addf %18, %20 : vector<8x128xf32>
    %cst_19 = arith.constant 0.000000e+00 : f32
    %22 = vector.broadcast %cst_19 : f32 to vector<8x128xf32>
    %23 = arith.maximumf %21, %22 : vector<8x128xf32>
    %c0_20 = arith.constant 0 : index
    %c0_21 = arith.constant 0 : index
    %24 = vector.load %arg9[%c0_20, %c0_21] : memref<128x128xf32, #tpu.memory_space<vmem>>, vector<128x128xf32>
    %cst_22 = arith.constant dense<0.000000e+00> : vector<8x128xf32>
    %25 = tpu.matmul %23, %24, %cst_22 {dimension_numbers = #tpu.dot_dimension_numbers<[1], [0], [0], [1], [0, 0, 1, 1], [], []>} : vector<8x128xf32>, vector<128x128xf32>, vector<8x128xf32> -> vector<8x128xf32>
    %c0_23 = arith.constant 0 : index
    %c0_24 = arith.constant 0 : index
    %26 = vector.load %arg10[%c0_23, %c0_24] : memref<1x128xf32, #tpu.memory_space<vmem>>, vector<1x128xf32>
    %27 = vector.broadcast %26 : vector<1x128xf32> to vector<8x128xf32>
    %28 = arith.addf %25, %27 : vector<8x128xf32>
    %c0_25 = arith.constant 0 : index
    %c0_26 = arith.constant 0 : index
    %29 = vector.load %arg16[%c0_25, %c0_26] : memref<8x128xf32, #tpu.memory_space<vmem>>, vector<8x128xf32>
    %cst_27 = arith.constant dense<0.000000e+00> : vector<128xf32>
    %30 = vector.multi_reduction <add>, %28, %cst_27 [0] : vector<8x128xf32> to vector<128xf32>
    %31 = vector.shape_cast %30 : vector<128xf32> to vector<1x128xf32>
    %32 = vector.broadcast %31 : vector<1x128xf32> to vector<8x128xf32>
    %33 = arith.addf %29, %32 : vector<8x128xf32>
    %c0_28 = arith.constant 0 : index
    %c0_29 = arith.constant 0 : index
    %34 = vector.load %arg16[%c0_28, %c0_29] : memref<8x128xf32, #tpu.memory_space<vmem>>, vector<8x128xf32>
    tpu.vector_store %arg16[%c0_28, %c0_29], %33 {strides = array<i32>} : memref<8x128xf32, #tpu.memory_space<vmem>>, vector<8x128xf32>,
    %c0_i32_30 = arith.constant 0 : i32
    %35 = arith.cmpi eq, %arg1, %c0_i32_30 : i32
    %36 = arith.extui %35 : i1 to i32
    %c0_i32_31 = arith.constant 0 : i32
    %37 = arith.cmpi ne, %36, %c0_i32_31 : i32
    scf.if %37 {
      %c0_32 = arith.constant 0 : index
      %c0_33 = arith.constant 0 : index
      %38 = vector.load %arg16[%c0_32, %c0_33] : memref<8x128xf32, #tpu.memory_space<vmem>>, vector<8x128xf32>
      %cst_34 = arith.constant 1.250000e-01 : f32
      %39 = vector.broadcast %cst_34 : f32 to vector<8x128xf32>
      %40 = arith.mulf %38, %39 : vector<8x128xf32>
      %c0_35 = arith.constant 0 : index
      %c0_36 = arith.constant 0 : index
      %41 = vector.load %arg11[%c0_35, %c0_36] : memref<128x128xf32, #tpu.memory_space<vmem>>, vector<128x128xf32>
      %cst_37 = arith.constant dense<0.000000e+00> : vector<8x128xf32>
      %42 = tpu.matmul %40, %41, %cst_37 {dimension_numbers = #tpu.dot_dimension_numbers<[1], [0], [0], [1], [0, 0, 1, 1], [], []>} : vector<8x128xf32>, vector<128x128xf32>, vector<8x128xf32> -> vector<8x128xf32>
      %c0_38 = arith.constant 0 : index
      %c0_39 = arith.constant 0 : index
      %43 = vector.load %arg12[%c0_38, %c0_39] : memref<1x128xf32, #tpu.memory_space<vmem>>, vector<1x128xf32>
      %44 = vector.broadcast %43 : vector<1x128xf32> to vector<8x128xf32>
      %45 = arith.addf %42, %44 : vector<8x128xf32>
      %cst_40 = arith.constant 0.000000e+00 : f32
      %46 = vector.broadcast %cst_40 : f32 to vector<8x128xf32>
      %47 = arith.maximumf %45, %46 : vector<8x128xf32>
      %c0_41 = arith.constant 0 : index
      %c0_42 = arith.constant 0 : index
      %48 = vector.load %arg13[%c0_41, %c0_42] : memref<128x128xf32, #tpu.memory_space<vmem>>, vector<128x128xf32>
      %cst_43 = arith.constant dense<0.000000e+00> : vector<8x128xf32>
      %49 = tpu.matmul %47, %48, %cst_43 {dimension_numbers = #tpu.dot_dimension_numbers<[1], [0], [0], [1], [0, 0, 1, 1], [], []>} : vector<8x128xf32>, vector<128x128xf32>, vector<8x128xf32> -> vector<8x128xf32>
      %c0_44 = arith.constant 0 : index
      %c0_45 = arith.constant 0 : index
      %50 = vector.load %arg14[%c0_44, %c0_45] : memref<1x128xf32, #tpu.memory_space<vmem>>, vector<1x128xf32>
      %51 = vector.broadcast %50 : vector<1x128xf32> to vector<8x128xf32>
      %52 = arith.addf %49, %51 : vector<8x128xf32>
      %53 = tpu.iota {dimensions = array<i32: 1>} : vector<8x128xi32>
      %cst_46 = arith.constant 0.000000e+00 : f32
      %54 = vector.broadcast %cst_46 : f32 to vector<8x128xf32>
      %55 = arith.subf %54, %52 : vector<8x128xf32>
      %56 = math.exp %55 : vector<8x128xf32>
      %cst_47 = arith.constant 1.000000e+00 : f32
      %57 = vector.broadcast %cst_47 : f32 to vector<8x128xf32>
      %58 = arith.addf %57, %56 : vector<8x128xf32>
      %cst_48 = arith.constant 0.899999976 : f32
      %59 = vector.broadcast %cst_48 : f32 to vector<8x128xf32>
      %60 = arith.divf %59, %58 : vector<8x128xf32>
      %cst_49 = arith.constant 1.000000e-01 : f32
      %61 = vector.broadcast %cst_49 : f32 to vector<8x128xf32>
      %62 = arith.addf %61, %60 : vector<8x128xf32>
      %c8_i32 = arith.constant 8 : i32
      %63 = vector.broadcast %c8_i32 : i32 to vector<8x128xi32>
      %64 = arith.cmpi sge, %53, %63 : vector<8x128xi32>
      %c16_i32 = arith.constant 16 : i32
      %65 = vector.broadcast %c16_i32 : i32 to vector<8x128xi32>
      %66 = arith.cmpi slt, %53, %65 : vector<8x128xi32>
      %67 = arith.andi %64, %66 : vector<8x128xi1>
      %68 = arith.select %67, %62, %52 : vector<8x128xi1>, vector<8x128xf32>
      %69 = vector.shape_cast %68 : vector<8x128xf32> to vector<1x8x128xf32>
      %c0_50 = arith.constant 0 : index
      %c0_51 = arith.constant 0 : index
      %c0_52 = arith.constant 0 : index
      %70 = vector.load %arg15[%c0_50, %c0_51, %c0_52] : memref<1x8x128xf32, #tpu.memory_space<vmem>>, vector<1x8x128xf32>
      tpu.vector_store %arg15[%c0_50, %c0_51, %c0_52], %69 {strides = array<i32>} : memref<1x8x128xf32, #tpu.memory_space<vmem>>, vector<1x8x128xf32>,
    } else {
    }
    return
  }
  func.func @transform_0(%arg0: i32, %arg1: i32) -> (i32, i32, i32) {
    %c0_i32 = arith.constant 0 : i32
    %c0_i32_0 = arith.constant 0 : i32
    return %arg0, %arg1, %c0_i32 : i32, i32, i32
  }
  func.func @transform_1(%arg0: i32, %arg1: i32) -> (i32, i32, i32) {
    %c0_i32 = arith.constant 0 : i32
    %c0_i32_0 = arith.constant 0 : i32
    return %arg0, %arg1, %c0_i32 : i32, i32, i32
  }
  func.func @transform_2(%arg0: i32, %arg1: i32) -> (i32, i32) {
    %c0_i32 = arith.constant 0 : i32
    %c0_i32_0 = arith.constant 0 : i32
    %c0_i32_1 = arith.constant 0 : i32
    return %c0_i32, %c0_i32_0 : i32, i32
  }
  func.func @transform_3(%arg0: i32, %arg1: i32) -> (i32, i32) {
    %c0_i32 = arith.constant 0 : i32
    %c0_i32_0 = arith.constant 0 : i32
    %c0_i32_1 = arith.constant 0 : i32
    return %c0_i32, %c0_i32_0 : i32, i32
  }
  func.func @transform_4(%arg0: i32, %arg1: i32) -> (i32, i32) {
    %c0_i32 = arith.constant 0 : i32
    %c0_i32_0 = arith.constant 0 : i32
    %c0_i32_1 = arith.constant 0 : i32
    return %c0_i32, %c0_i32_0 : i32, i32
  }
  func.func @transform_5(%arg0: i32, %arg1: i32) -> (i32, i32) {
    %c0_i32 = arith.constant 0 : i32
    %c0_i32_0 = arith.constant 0 : i32
    %c0_i32_1 = arith.constant 0 : i32
    return %c0_i32, %c0_i32_0 : i32, i32
  }
  func.func @transform_6(%arg0: i32, %arg1: i32) -> (i32, i32) {
    %c0_i32 = arith.constant 0 : i32
    %c0_i32_0 = arith.constant 0 : i32
    %c0_i32_1 = arith.constant 0 : i32
    return %c0_i32, %c0_i32_0 : i32, i32
  }
  func.func @transform_7(%arg0: i32, %arg1: i32) -> (i32, i32) {
    %c0_i32 = arith.constant 0 : i32
    %c0_i32_0 = arith.constant 0 : i32
    %c0_i32_1 = arith.constant 0 : i32
    return %c0_i32, %c0_i32_0 : i32, i32
  }
  func.func @transform_8(%arg0: i32, %arg1: i32) -> (i32, i32) {
    %c0_i32 = arith.constant 0 : i32
    %c0_i32_0 = arith.constant 0 : i32
    %c0_i32_1 = arith.constant 0 : i32
    return %c0_i32, %c0_i32_0 : i32, i32
  }
  func.func @transform_9(%arg0: i32, %arg1: i32) -> (i32, i32) {
    %c0_i32 = arith.constant 0 : i32
    %c0_i32_0 = arith.constant 0 : i32
    %c0_i32_1 = arith.constant 0 : i32
    return %c0_i32, %c0_i32_0 : i32, i32
  }
  func.func @transform_10(%arg0: i32, %arg1: i32) -> (i32, i32) {
    %c0_i32 = arith.constant 0 : i32
    %c0_i32_0 = arith.constant 0 : i32
    %c0_i32_1 = arith.constant 0 : i32
    return %c0_i32, %c0_i32_0 : i32, i32
  }
  func.func @transform_11(%arg0: i32, %arg1: i32) -> (i32, i32) {
    %c0_i32 = arith.constant 0 : i32
    %c0_i32_0 = arith.constant 0 : i32
    %c0_i32_1 = arith.constant 0 : i32
    return %c0_i32, %c0_i32_0 : i32, i32
  }
  func.func @transform_12(%arg0: i32, %arg1: i32) -> (i32, i32) {
    %c0_i32 = arith.constant 0 : i32
    %c0_i32_0 = arith.constant 0 : i32
    %c0_i32_1 = arith.constant 0 : i32
    return %c0_i32, %c0_i32_0 : i32, i32
  }
  func.func @transform_13(%arg0: i32, %arg1: i32) -> (i32, i32, i32) {
    %c0_i32 = arith.constant 0 : i32
    %c0_i32_0 = arith.constant 0 : i32
    %c0_i32_1 = arith.constant 0 : i32
    return %arg0, %c0_i32, %c0_i32_0 : i32, i32, i32
  }
}

</mosaic_0001>

<bundles_post_ra>
// kernel: tpu_custom_call.1
= control target key start
LH: loop header
LB: loop body
LE: loop exit
PB: predicated region body
PF: predicated region fallthrough
CT: control target
= control target key end

     0   :  { %s1857_s0 = inlined_call_operand.hbm [shape: f32[2,8,8], index: 0, kind: input, shape index: {}]   ;;  %s1858_s1 = inlined_call_operand.hbm [shape: f32[2,8,8], index: 1, kind: input, shape index: {}]   ;;  %s1859_s2 = inlined_call_operand.hbm [shape: f32[8,128], index: 2, kind: input, shape index: {}]   ;;  %s1860_s3 = inlined_call_operand.hbm [shape: f32[8,128], index: 3, kind: input, shape index: {}]   ;;  %s1861_s4 = inlined_call_operand.vmem [shape: f32[1,128], index: 4, kind: input, shape index: {}]   ;;  %s1862_s5 = inlined_call_operand.hbm [shape: f32[128,128], index: 5, kind: input, shape index: {}]   ;;  %s1863_s6 = inlined_call_operand.vmem [shape: f32[1,128], index: 6, kind: input, shape index: {}]   ;;  %s1864_s7 = inlined_call_operand.hbm [shape: f32[128,128], index: 7, kind: input, shape index: {}]   ;;  %s1865_s8 = inlined_call_operand.vmem [shape: f32[1,128], index: 8, kind: input, shape index: {}]   ;;  %s1866_s9 = inlined_call_operand.hbm [shape: f32[128,128], index: 9, kind: input, shape index: {}]   ;;  %s1867_s10 = inlined_call_operand.vmem [shape: f32[1,128], index: 10, kind: input, shape index: {}]   ;;  %s1868_s11 = inlined_call_operand.hbm [shape: f32[128,128], index: 11, kind: input, shape index: {}]   ;;  %s1869_s12 = inlined_call_operand.vmem [shape: f32[1,128], index: 12, kind: input, shape index: {}]   ;;  %s1870_s13 = inlined_call_operand.hbm [shape: f32[2,8,128], index: 13, kind: output, shape index: {}]  }
   0x1   :  { %1875 = sst [smem:[#allocation30_spill]] %s1859_s2 }
   0x2   :  { %1876 = sst [smem:[#allocation31_spill]] %s1860_s3 }
   0x3   :  { %1877 = sst [smem:[#allocation32_spill]] %s1862_s5 }
   0x4   :  { %1878 = sst [smem:[#allocation33_spill]] %s1864_s7 }
   0x5   :  { %1879 = sst [smem:[#allocation34_spill]] %s1866_s9 }
   0x6   :  { %1880 = sst [smem:[#allocation35_spill]] %s1867_s10 }
   0x7   :  { %1881 = sst [smem:[#allocation36_spill]] %s1868_s11 }
   0x8   :  { %1882 = sst [smem:[#allocation37_spill]] %s1869_s12 }
   0x9   :  { %1883 = sst [smem:[#allocation38_spill]] %s1870_s13 }
   0xa   :  { %18 = vsyncpa [#allocation4], 0 }
   0xb   :  { %20 = vsyncpa [#allocation4 + $0x1], 0 }
   0xc   :  { %21 = vsyncpa [#allocation7], 0 }
   0xd   :  { %23 = vsyncpa [#allocation7 + $0x1], 0 }
   0xe   :  { %24 = vsyncpa [#allocation10], 0 }
   0xf   :  { %25 = vsyncpa [#allocation13], 0 }
  0x10   :  { %26 = vsyncpa [#allocation16], 0 }
  0x11   :  { %27 = vsyncpa [#allocation5], 0 }
  0x12   :  { %29 = vsyncpa [#allocation5 + $0x1], 0  ;;  %s1642_s25 = smov 0   ;;  %s1644_s26 = smov 0  }
  0x13   :  { %s1646_s27 = smov 0   ;;  %s1648_s28 = smov 0  }
  0x14   :  { %s1650_s29 = smov 0   ;;  %s1652_s30 = smov 0  }
  0x15 LB: > { %1884 = sst [smem:[#allocation25_spill]] %s1550_s27  ;;  %s1673_s14 = sadd.s32 4294967295, %s1562_s30   ;;  %s1562_s30 = sphi %s1652_s30, %s35_s30   ;;  %s1558_s29 = sphi %s1650_s29, %s1908_s29   ;;  %s1554_s28 = sphi %s1648_s28, %s1907_s28   ;;  %s1550_s27 = sphi %s1646_s27, %s1906_s27   ;;  %s1546_s26 = sphi %s1644_s26, %s1910_s26   ;;  %s1542_s25 = sphi %s1642_s25, %s1909_s25  }
  0x16   : > { %1885 = sst [smem:[#allocation26_spill]] %s1554_s28  ;;  %p1053_p0 = scmp.ge.s32.totalorder %s1562_s30, 1 }
  0x17   : > { %1886 = sst [smem:[#allocation27_spill]] %s1558_s29  ;;  %p70_p1 = scmp.eq.s32.totalorder %s1673_s14, 0 }
  0x18   : > { %p365_p2 = scmp.lt.s32.totalorder %s1562_s30, 3  ;;  %s1887_s2 = sld [smem:[#allocation30_spill]] }
  0x19   : > { %p1060_p4 = scmp.ge.s32.totalorder %s1562_s30, 2  ;;  %s1564_s19 = smov [#allocation8]  }
  0x1a   : > { %p1681_p3 = pnand %p1053_p0, %p365_p2  ;;  %s379_s20 = sshll.u32 %s1564_s19, 4  ;;  %s380_s20 = int_to_ptr.vmem [resolvable:$true] %s379_s20 }
  0x1b   : > { %s1889_s3 = sld [smem:[#allocation31_spill]]  ;;  %s1565_s15 = smov [#allocation9]  }
  0x1c   : > { %p1111_p5 = pneg %p1681_p3  ;;  %s391_s16 = sshll.u32 %s1565_s15, 4  ;;  %s392_s16 = int_to_ptr.vmem [resolvable:$true] %s391_s16 }
  0x1d   : > { %s1891_s7 = sld [smem:[#allocation33_spill]]  ;;  %s1566_s22 = smov [#allocation12]  }
  0x1e   : > { %s377_s17 = sshll.u32 %s1887_s2, 4  ;;  %p1693_p6 = pnand %p1111_p5, %p70_p1  ;;  %s378_s17 = int_to_ptr.hbm [resolvable:$true] %s377_s17 }
  0x1f   : > { %s1892_s5 = sld [smem:[#allocation32_spill]]  ;;  %s1567_s15 = smov 128  }
  0x20   : > { %1114 = dma.hbm_to_vmem [thread:$0]  (!%p1693_p6), %s378_s17, 128, %s380_s20, [#allocation7]  }
  0x21   : > { %s389_s23 = sshll.u32 %s1889_s3, 4  ;;  %s422_s3 = sshll.u32 %s1566_s22, 4  ;;  %s390_s23 = int_to_ptr.hbm [resolvable:$true] %s389_s23  ;;  %s423_s3 = int_to_ptr.vmem [resolvable:$true] %s422_s3 }
  0x22   : > { %1117 = dma.hbm_to_vmem [thread:$0]  (!%p1693_p6), %s390_s23, 128, %s392_s16, [#allocation10]  }
  0x23   : > { %s420_s21 = sshll.u32 %s1891_s7, 4  ;;  %s1568_s10 = smov 8   ;;  %s421_s21 = int_to_ptr.hbm [resolvable:$true] %s420_s21 }
  0x24   : > { %1123 = dma.hbm_to_vmem [thread:$0]  (!%p1693_p6), %s421_s21, 2048, %s423_s3, [#allocation13], %s1567_s15, %s1567_s15, %s1568_s10  }
  0x25   : > { %s403_s12 = sshll.u32 %s1892_s5, 4  ;;  %s1569_s17 = smov [#allocation11]   ;;  %s404_s12 = int_to_ptr.hbm [resolvable:$true] %s403_s12 }
  0x26   : > { %s405_s2 = sshll.u32 %s1569_s17, 4  ;;  %s1893_s9 = sld [smem:[#allocation34_spill]]  ;;  %s406_s2 = int_to_ptr.vmem [resolvable:$true] %s405_s2 }
  0x27   : > { %1120 = dma.hbm_to_vmem [thread:$0]  (!%p1693_p6), %s404_s12, 2048, %s406_s2, [#allocation10], %s1567_s15, %s1567_s15, %s1568_s10  }
  0x28   : > { %s1894_s11 = sld [smem:[#allocation36_spill]]  ;;  %s1570_s19 = smov [#allocation14]  }
  0x29   : > { %s439_s21 = sshll.u32 %s1570_s19, 4  ;;  %s1571_s22 = smov [#allocation15]   ;;  %s440_s21 = int_to_ptr.vmem [resolvable:$true] %s439_s21 }
  0x2a   : > { %s456_s17 = sshll.u32 %s1571_s22, 4  ;;  %s1052_s12 = sadd.s32 4294967294, %s1562_s30   ;;  %s457_s17 = int_to_ptr.vmem [resolvable:$true] %s456_s17 }
  0x2b   : > { %s47_s2 = sadd.s32 1, %s1558_s29  ;;  %s56_s20 = sadd.s32 1, %s1550_s27 }
  0x2c   : > { %s437_s16 = sshll.u32 %s1893_s9, 4  ;;  %p49_p7 = scmp.ge.s32.totalorder %s47_s2, 2  ;;  %s438_s16 = int_to_ptr.hbm [resolvable:$true] %s437_s16 }
  0x2d   : > { %1126 = dma.hbm_to_vmem [thread:$0]  (!%p1693_p6), %s438_s16, 2048, %s440_s21, [#allocation13], %s1567_s15, %s1567_s15, %s1568_s10  }
  0x2e   : > { %s454_s3 = sshll.u32 %s1894_s11, 4  ;;  %p63_p8 = scmp.ne.s32.totalorder %s1550_s27, %s1546_s26  ;;  %s455_s3 = int_to_ptr.hbm [resolvable:$true] %s454_s3 }
  0x2f   : > { %1129 = dma.hbm_to_vmem [thread:$0]  (!%p1693_p6), %s455_s3, 2048, %s457_s17, [#allocation16], %s1567_s15, %s1567_s15, %s1568_s10  }
  0x30   : > { %p64_p9 = scmp.eq.s32.totalorder %s1562_s30, 0  ;;  %s1912_s2 = smov (%p49_p7, %s47_s2), 0 }
  0x31   : > { %1895 = sst [smem:[#allocation28_spill]] %s1912_s2  ;;  %p69_p11 = scmp.ne.s32.totalorder %s1546_s26, %s1542_s25 }
  0x32   : > { %p1729_p10 = por %p64_p9, %p63_p8  ;;  %s51_s24 = ssub.s32 %s1558_s29, %s1912_s2 }
  0x33   : > { %p352_p12 = scmp.eq.s32.totalorder %s1673_s14, 1  ;;  %p54_p13 = scmp.eq.s32.totalorder %s51_s24, 0 }
  0x34   : > { %p1740_p0 = por %p70_p1, %p69_p11  ;;  %p358_p5 = scmp.eq.s32.totalorder %s1052_s12, 1 }
  0x35   : > { %p1744_p2 = por %p352_p12, %p63_p8  ;;  %p1147_p7 = scmp.lt.s32.totalorder %s1562_s30, 2 }
  0x36   : > { %s1749_s16 = scalar_select %p54_p13, %s1550_s27, %s56_s20  }
  0x37   : > { %p1751_p6 = por %p358_p5, %p69_p11  ;;  %s473_s28 = sand.u32 1, %s1550_s27  }
  0x38   : > { %1899 = sst [smem:[#allocation29_spill]] %s1749_s16  ;;  %s1062_s3 = sshll.u32 %s1558_s29, 3 }
  0x39   : > { %s1061_s19 = sshll.u32 %s473_s28, 3  ;;  %s482_s17 = scalar_lea.hbm %s1857_s0, %s1062_s3 }
  0x3a   : > { %s484_s24 = sshll.u32 %s482_s17, 4  ;;  %s477_s5 = scalar_lea.vmem [#allocation3], %s1061_s19  ;;  %s485_s24 = int_to_ptr.hbm [resolvable:$true] %s484_s24 }
  0x3b   : > { %s486_s7 = sshll.u32 %s477_s5, 4  ;;  %p1131_p8 = pnand %p1147_p7, %p1729_p10  ;;  %s487_s7 = int_to_ptr.vmem [resolvable:$true] %s486_s7 }
  0x3c   : > { %s502_s9 = scalar_lea.hbm %s1858_s1, %s1062_s3  ;;  %s493_s11 = sand.u32 1, %s1562_s30  }
  0x3d   : > { %s474_s2 = scalar_lea.sflag [#allocation4], %s473_s28  ;;  %s504_s29 = sshll.u32 %s502_s9, 4  ;;  %s505_s29 = int_to_ptr.hbm [resolvable:$true] %s504_s29 }
  0x3e   : > { %1133 = dma.hbm_to_vmem [thread:$0]  (!%p1131_p8), %s485_s24, 128, %s487_s7, %s474_s2  }
  0x3f   : > { %s497_s16 = scalar_lea.vmem [#allocation6], %s1061_s19  ;;  %s494_s21 = scalar_lea.sflag [#allocation7], %s493_s11 }
  0x40   : > { %s506_s27 = sshll.u32 %s497_s16, 4  ;;  %515 = sbr.rel (%p1681_p3) target bundleno = 795 (0x31b), region = 72  ;;  %s507_s27 = int_to_ptr.vmem [resolvable:$true] %s506_s27 }
  0x41   : > { %1136 = dma.hbm_to_vmem [thread:$0]  (!%p1131_p8), %s505_s29, 128, %s507_s27, %s494_s21  }
  0x42   : > { %s1770_s5 = sand.u32 (!%p1681_p3), 1, %s1546_s26  }
  0x43   : > { %s1773_s23 = sshll.u32 (!%p1681_p3), %s1770_s5, 3  ;;  %s518_s7 = scalar_lea.sflag (!%p1681_p3), [#allocation4], %s1770_s5 }
  0x44   : > { %s521_s9 = scalar_lea.vmem (!%p1681_p3), [#allocation3], %s1773_s23 }
  0x45   : > { %1513 = dma.done.wait (%p1740_p0), %s518_s7, 128  }
  0x46   : > { %1515 = vsyncadd (%p1740_p0), %s518_s7, 4294967168  ;;  %s527_s11 = sand.u32 1, %s1673_s14   ;;  %s531_s29 = scalar_lea.vmem [#allocation6], %s1773_s23 }
  0x47   : > { %s528_s27 = scalar_lea.sflag [#allocation7], %s527_s11 }
  0x48   : > { %1517 = dma.done.wait (%p1740_p0), %s528_s27, 128  }
  0x49   : > { %1519 = vsyncadd (%p1740_p0), %s528_s27, 4294967168 }
  0x4a   : > { %1521 = dma.done.wait (%p70_p1), [#allocation7], 128  }
  0x4b   : > { %1523 = vsyncadd (%p70_p1), [#allocation7], 4294967168 }
  0x4c   : > { %1525 = dma.done.wait (%p70_p1), [#allocation10], 2176  }
  0x4d   : > { %1527 = vsyncadd (%p70_p1), [#allocation10], 4294965120 }
  0x4e   : > { %1529 = dma.done.wait (%p70_p1), [#allocation13], 4096  }
  0x4f   : > { %1531 = vsyncadd (%p70_p1), [#allocation13], 4294963200 }
  0x50   : > { %1533 = dma.done.wait (%p70_p1), [#allocation16], 2048  }
  0x51   : > { %1535 = vsyncadd (%p70_p1), [#allocation16], 4294965248  ;;  %vm619_vm0 = vcmask 64512   ;;  %v618_v0 = vld [vmem:[#allocation9] sm:$0xff]  ;;  %v616_v1 = vld [vmem:[#allocation8] sm:$0xff]  ;;  %s1901_s22 = sld [smem:[#allocation35_spill]] }
  0x52   : > { %v617_v2 = vld [vmem:[%s531_s29] sm:$0xff]  ;;  %638 = vmatpush.msra.mxu0 %v618_v0  ;;  %661 = vmatpush.msra.mxu1 %v616_v1  ;;  %v615_v3 = vld [vmem:[%s521_s9] sm:$0xff]  ;;  %s1902_s12 = sld [smem:[#allocation37_spill]]  ;;  %s609_s29 = scalar_lea.vmem [#allocation17], %s1773_s23 }
  0x53   : > { %v687_v4 = vld [vmem:[#allocation11 + $0x78] sm:$0xff]  ;;  %1075 = vmatmul.msk.f32.vlgmr.msra.gmra.mxu0 %vm619_vm0, %v617_v2  ;;  %1076 = vmatmul.msk.f32.vlgmr.msra.gmra.mxu1 %vm619_vm0, %v615_v3  ;;  %v686_v5 = vld [vmem:[#allocation11 + $0x70] sm:$0xff]  ;;  %v685_v6 = vld [vmem:[#allocation11 + $0x68] sm:$0xff]  ;;  %s1903_s20 = sld [smem:[#allocation26_spill]]  ;;  %s888_s14 = sshll.u32 %s609_s29, 4  ;;  %s889_s14 = int_to_ptr.vmem [resolvable:$true] %s888_s14 }
  0x54   : > { %692 = vmatpush.msra.mxu2 %v687_v4  ;;  %v684_v7 = vld [vmem:[#allocation11 + $0x60] sm:$0xff]  ;;  %v683_v8 = vld [vmem:[#allocation11 + $0x58] sm:$0xff]  ;;  %v682_v9 = vld [vmem:[#allocation11 + $0x50] sm:$0xff]  ;;  %s1904_s11 = sld [smem:[#allocation38_spill]]  ;;  %s876_s2 = scalar_lea.sflag [#allocation5], %s1770_s5 }
  0x55   : > { %v681_v10 = vld [vmem:[#allocation11 + $0x48] sm:$0xff]  ;;  %v680_v11 = vld [vmem:[#allocation11 + $0x40] sm:$0xff]  ;;  %v679_v12 = vld [vmem:[#allocation11 + $0x38] sm:$0xff] }
  0x56   : > { %693 = vmatpush.msra.mxu2 %v686_v5  ;;  %v678_v13 = vld [vmem:[#allocation11 + $0x30] sm:$0xff]  ;;  %v677_v14 = vld [vmem:[#allocation11 + $0x28] sm:$0xff]  ;;  %v676_v15 = vld [vmem:[#allocation11 + $0x20] sm:$0xff] }
  0x57   : > { %v675_v16 = vld [vmem:[#allocation11 + $0x18] sm:$0xff]  ;;  %v674_v17 = vld [vmem:[#allocation11 + $0x10] sm:$0xff]  ;;  %v673_v18 = vld [vmem:[#allocation11 + $0x8] sm:$0xff] }
  0x58   : > { %694 = vmatpush.msra.mxu2 %v685_v6  ;;  %v672_v19 = vld [vmem:[#allocation11] sm:$0xff]  ;;  %v728_v20 = vld [vmem:[#allocation12 + $0x78] sm:$0xff]  ;;  %v727_v21 = vld [vmem:[#allocation12 + $0x70] sm:$0xff] }
  0x59   : > { %733 = vmatpush.msra.mxu3 %v728_v20  ;;  %v726_v22 = vld [vmem:[#allocation12 + $0x68] sm:$0xff]  ;;  %v725_v23 = vld [vmem:[#allocation12 + $0x60] sm:$0xff]  ;;  %v724_v24 = vld [vmem:[#allocation12 + $0x58] sm:$0xff]  ;;  %s1078_s21 = sshll.u32 %s1903_s20, 3 }
  0x5a   : > { %695 = vmatpush.msra.mxu2 %v684_v7  ;;  %v723_v25 = vld [vmem:[#allocation12 + $0x50] sm:$0xff]  ;;  %v722_v26 = vld [vmem:[#allocation12 + $0x48] sm:$0xff]  ;;  %v721_v27 = vld [vmem:[#allocation12 + $0x40] sm:$0xff]  ;;  %s886_s27 = scalar_lea.hbm %s1904_s11, %s1078_s21  ;;  %s1480_s23 = scalar_lea.hbm %s1904_s11, 16 }
  0x5b   : > { %734 = vmatpush.msra.mxu3 %v727_v21  ;;  %v720_v28 = vld [vmem:[#allocation12 + $0x38] sm:$0xff]  ;;  %v719_v29 = vld [vmem:[#allocation12 + $0x30] sm:$0xff]  ;;  %v718_v30 = vld [vmem:[#allocation12 + $0x28] sm:$0xff]  ;;  %s890_s18 = sshll.u32 %s886_s27, 4  ;;  %s891_s18 = int_to_ptr.hbm [resolvable:$true] %s890_s18 }
  0x5c   : > { %696 = vmatpush.msra.mxu2 %v683_v8  ;;  %v717_v31 = vld [vmem:[#allocation12 + $0x20] sm:$0xff]  ;;  %v716_v32 = vld [vmem:[#allocation12 + $0x18] sm:$0xff]  ;;  %v1211_v33 = vld [vmem:[%s1861_s4] ss:$0 sm:$0xff]  ;;  %s1474_s10 = sshra.s32 %s891_s18, 4  ;;  %s1475_s10 = int_to_ptr.hbm [resolvable:$true] %s1474_s10 }
  0x5d   : > { %735 = vmatpush.msra.mxu3 %v726_v22  ;;  %v715_v39 = vld [vmem:[#allocation12 + $0x10] sm:$0xff]  ;;  %v714_v40 = vld [vmem:[#allocation12 + $0x8] sm:$0xff]  ;;  %v713_v41 = vld [vmem:[#allocation12] sm:$0xff]  ;;  %s1476_s16 = scalar_lea.hbm %s1475_s10, 8  ;;  %p1481_p10 = scmp.lt.s32.totalorder %s1475_s10, %s1904_s11 }
  0x5e   : > { %697 = vmatpush.msra.mxu2 %v682_v9  ;;  %v782_v42 = vld [vmem:[#allocation14 + $0x78] sm:$0xff]  ;;  %v781_v43 = vld [vmem:[#allocation14 + $0x70] sm:$0xff]  ;;  %v780_v44 = vld [vmem:[#allocation14 + $0x68] sm:$0xff]  ;;  %p1477_p1 = scmp.ne.s32.totalorder %s1475_s10, %s1476_s16  ;;  %p1482_p11 = scmp.lt.s32.totalorder %s1480_s23, %s1476_s16 }
  0x5f   : > { %736 = vmatpush.msra.mxu3 %v725_v23  ;;  %787 = vmatpush.msrb.mxu0 %v782_v42  ;;  %v779_v45 = vld [vmem:[#allocation14 + $0x60] sm:$0xff]  ;;  %v778_v46 = vld [vmem:[#allocation14 + $0x58] sm:$0xff]  ;;  %v777_v47 = vld [vmem:[#allocation14 + $0x50] sm:$0xff] }
  0x60   : > { %698 = vmatpush.msra.mxu2 %v681_v10  ;;  %v776_v48 = vld [vmem:[#allocation14 + $0x48] sm:$0xff]  ;;  %v1212_v49 = vld [vmem:[%s1863_s6] ss:$0 sm:$0xff]  ;;  %v775_v53 = vld [vmem:[#allocation14 + $0x40] sm:$0xff]  ;;  %p1478_p3 = pnand %p1477_p1, %p1744_p2  ;;  %p1483_p12 = por %p1482_p11, %p1481_p10 }
  0x61   : > { %737 = vmatpush.msra.mxu3 %v724_v24  ;;  %788 = vmatpush.msrb.mxu0 %v781_v43  ;;  %v774_v54 = vld [vmem:[#allocation14 + $0x38] sm:$0xff]  ;;  %v773_v55 = vld [vmem:[#allocation14 + $0x30] sm:$0xff]  ;;  %v772_v56 = vld [vmem:[#allocation14 + $0x28] sm:$0xff] }
  0x62   : > { %699 = vmatpush.msra.mxu2 %v680_v11  ;;  %v771_v57 = vld [vmem:[#allocation14 + $0x20] sm:$0xff]  ;;  %v770_v58 = vld [vmem:[#allocation14 + $0x18] sm:$0xff]  ;;  %v769_v59 = vld [vmem:[#allocation14 + $0x10] sm:$0xff]  ;;  %p1479_p9 = pneg %p1478_p3 }
  0x63   : > { %738 = vmatpush.msra.mxu3 %v723_v25  ;;  %789 = vmatpush.msrb.mxu0 %v780_v44  ;;  %v768_v60 = vld [vmem:[#allocation14 + $0x8] sm:$0xff]  ;;  %v767_v61 = vld [vmem:[#allocation14] sm:$0xff]  ;;  %v823_v62 = vld [vmem:[#allocation15 + $0x78] sm:$0xff] }
  0x64   : > { %700 = vmatpush.msra.mxu2 %v679_v12  ;;  %v822_v63 = vld [vmem:[#allocation15 + $0x70] sm:$0xff]  ;;  %828 = vmatpush.msrb.mxu1 %v823_v62  ;;  %v821_v0 = vld [vmem:[#allocation15 + $0x68] sm:$0xff]  ;;  %v820_v1 = vld [vmem:[#allocation15 + $0x60] sm:$0xff]  ;;  %p1484_p13 = pnand %p1483_p12, %p1479_p9 }
  0x65   : > { %739 = vmatpush.msra.mxu3 %v722_v26  ;;  %790 = vmatpush.msrb.mxu0 %v779_v45  ;;  %v819_v2 = vld [vmem:[#allocation15 + $0x58] sm:$0xff]  ;;  %v818_v3 = vld [vmem:[#allocation15 + $0x50] sm:$0xff]  ;;  %v817_v4 = vld [vmem:[#allocation15 + $0x48] sm:$0xff] }
  0x66   : > { %701 = vmatpush.msra.mxu2 %v678_v13  ;;  %829 = vmatpush.msrb.mxu1 %v822_v63  ;;  %v1213_v5 = vld [vmem:[%s1865_s8] ss:$0 sm:$0xff]  ;;  %v816_v6 = vld [vmem:[#allocation15 + $0x40] sm:$0xff]  ;;  %v815_v7 = vld [vmem:[#allocation15 + $0x38] sm:$0xff] }
  0x67   : > { %740 = vmatpush.msra.mxu3 %v721_v27  ;;  %791 = vmatpush.msrb.mxu0 %v778_v46  ;;  %v814_v10 = vld [vmem:[#allocation15 + $0x30] sm:$0xff]  ;;  %v813_v12 = vld [vmem:[#allocation15 + $0x28] sm:$0xff]  ;;  %v808_v23 = vld [vmem:[#allocation15] sm:$0xff] }
  0x68   : > { %702 = vmatpush.msra.mxu2 %v677_v14  ;;  %830 = vmatpush.msrb.mxu1 %v821_v0  ;;  %v812_v14 = vld [vmem:[#allocation15 + $0x20] sm:$0xff]  ;;  %v810_v21 = vld [vmem:[#allocation15 + $0x10] sm:$0xff]  ;;  %v809_v22 = vld [vmem:[#allocation15 + $0x8] sm:$0xff] }
  0x69   : > { %741 = vmatpush.msra.mxu3 %v720_v28  ;;  %792 = vmatpush.msrb.mxu0 %v777_v47  ;;  %v1214_v24 = vld [vmem:[%s1901_s22] ss:$0 sm:$0xff] }
  0x6a   : > { %703 = vmatpush.msra.mxu2 %v676_v15  ;;  %831 = vmatpush.msrb.mxu1 %v820_v1  ;;  %v1215_v28 = vld [vmem:[%s1902_s12] ss:$0 sm:$0xff] }
  0x6b   : > { %742 = vmatpush.msra.mxu3 %v719_v29  ;;  %793 = vmatpush.msrb.mxu0 %v776_v48 }
  0x6c   : > { %704 = vmatpush.msra.mxu2 %v675_v16  ;;  %832 = vmatpush.msrb.mxu1 %v819_v2  ;;  %v811_v16 = vld [vmem:[#allocation15 + $0x18] sm:$0xff] }
  0x6d   : > { %743 = vmatpush.msra.mxu3 %v718_v30  ;;  %794 = vmatpush.msrb.mxu0 %v775_v53 }
  0x6e   : > { %705 = vmatpush.msra.mxu2 %v674_v17  ;;  %833 = vmatpush.msrb.mxu1 %v818_v3 }
  0x6f   : > { %744 = vmatpush.msra.mxu3 %v717_v31  ;;  %795 = vmatpush.msrb.mxu0 %v774_v54 }
  0x70   : > { %706 = vmatpush.msra.mxu2 %v673_v18  ;;  %834 = vmatpush.msrb.mxu1 %v817_v4 }
  0x71   : > { %745 = vmatpush.msra.mxu3 %v716_v32  ;;  %796 = vmatpush.msrb.mxu0 %v773_v55 }
  0x72   : > { %707 = vmatpush.msra.mxu2 %v672_v19  ;;  %835 = vmatpush.msrb.mxu1 %v816_v6 }
  0x73   : > { %746 = vmatpush.msra.mxu3 %v715_v39  ;;  %797 = vmatpush.msrb.mxu0 %v772_v56 }
  0x74   : > { %836 = vmatpush.msrb.mxu1 %v815_v7 }
  0x75   : > { %747 = vmatpush.msra.mxu3 %v714_v40  ;;  %798 = vmatpush.msrb.mxu0 %v771_v57 }
  0x76   : > { %837 = vmatpush.msrb.mxu1 %v814_v10 }
  0x77   : > { %748 = vmatpush.msra.mxu3 %v713_v41  ;;  %799 = vmatpush.msrb.mxu0 %v770_v58 }
  0x78   : > { %838 = vmatpush.msrb.mxu1 %v813_v12 }
  0x79   : > { %800 = vmatpush.msrb.mxu0 %v769_v59 }
  0x7a   : > { %839 = vmatpush.msrb.mxu1 %v812_v14 }
  0x7b   : > { %801 = vmatpush.msrb.mxu0 %v768_v60 }
  0x7c   : > { %840 = vmatpush.msrb.mxu1 %v811_v16 }
  0x7d   : > { %802 = vmatpush.msrb.mxu0 %v767_v61 }
  0x7e   : > { %841 = vmatpush.msrb.mxu1 %v810_v21 }
  0x80   : > { %842 = vmatpush.msrb.mxu1 %v809_v22 }
  0x82   : > { %843 = vmatpush.msrb.mxu1 %v808_v23 }
  0xd0   : > { %v640_v34 = vpop.f32.mrf.mxu0  ;;  %v663_v35 = vpop.f32.mrf.mxu1 }
  0xd1   : > { %v664_v36 = vadd.f32 %v663_v35, %v640_v34 }
  0xd3   : > { %v670_v37 = vadd.f32 %v1211_v33, %v664_v36  ;;  %v848_v36 = vlaneseq }
  0xd5   : > { %v671_v38 = vmax.f32 %v670_v37, 0.0  ;;  %v849_v40 = vand.u32 127, %v848_v36 }
  0xd7   : > { %708 = vmatmul.f32.vlgmr.msra.gmra.mxu2 %v671_v38  ;;  %vm870_vm5 = vcmp.ge.s32.totalorder %v849_v40, 8  ;;  %vm871_vm6 = vcmp.lt.s32.totalorder %v849_v40, 16 }
  0xd8   : > { %vm872_vm7 = vmand %vm870_vm5, %vm871_vm6 }
 0x15a   : > { %v709_v50 = vpop.f32.mrf.mxu2 }
 0x15b   : > { %v710_v51 = vadd.f32 %v1212_v49, %v709_v50 }
 0x15d   : > { %v712_v52 = vmax.f32 %v710_v51, 0.0 }
 0x15f   : > { %749 = vmatmul.f32.vlgmr.msra.gmra.mxu3 %v712_v52 }
 0x1e2   : > { %v750_v8 = vpop.f32.mrf.mxu3 }
 0x1e3   : > { %v751_v9 = vadd.f32 %v1213_v5, %v750_v8 }
 0x1e5   : > { %v754_v11 = vrot.slane %v751_v9, 4 }
 0x1e7   : > { %v755_v13 = vadd.f32 %v754_v11, %v751_v9 }
 0x1e9   : > { %v756_v15 = vrot.slane %v755_v13, 2 }
 0x1eb   : > { %v757_v17 = vadd.f32 %v756_v15, %v755_v13 }
 0x1ed   : > { %v758_v18 = vrot.slane %v757_v17, 1 }
 0x1ef   : > { %v759_v19 = vadd.f32 %v758_v18, %v757_v17 }
 0x1f1   : > { %v766_v20 = vmul.f32 0.125, %v759_v19 }
 0x1f3   : > { %803 = vmatmul.f32.vlgmr.msrb.gmra.mxu0 %v766_v20 }
 0x270   : > { %v804_v25 = vpop.f32.mrf.mxu0 }
 0x271   : > { %v805_v26 = vadd.f32 %v1214_v24, %v804_v25 }
 0x273   : > { %v807_v27 = vmax.f32 %v805_v26, 0.0 }
 0x275   : > { %844 = vmatmul.f32.vlgmr.msrb.gmra.mxu1 %v807_v27 }
 0x2f2   : > { %v845_v29 = vpop.f32.mrf.mxu1 }
 0x2f3   : > { %v846_v30 = vadd.f32 %v1215_v28, %v845_v29 }
 0x2f5   : > { %v850_v31 = vsub.f32 0.0, %v846_v30 }
 0x2f7   : > { %v851_v32 = vmul.f32 1.442695, %v850_v31 }
 0x2f9   : > { %1216 = vpow2.f32 %v851_v32 }
 0x2ff   : > { %v1217_v33 = vpop.eup %1216 }
 0x300   : > { %v853_v34 = vadd.f32 1.0, %v1217_v33 }
 0x302   : > { %1218 = vrcp.f32 %v853_v34  ;;  %v865_v39 = vand.u32 2147483648, %v853_v34  ;;  %v863_v42 = vand.u32 2147483647, %v853_v34  ;;  %vm859_vm2 = vweird.f32 %v853_v34 }
 0x304   : > { %v866_v44 = vor.u32 1.1754944e-38, %v865_v39  ;;  %vm864_vm4 = vcmp.eq.f32.partialorder %v863_v42, 8.507059e+37 }
 0x308   : > { %v1219_v35 = vpop.eup %1218 }
 0x309   : > { %v855_v37 = vmul.f32 %v1219_v35, %v853_v34  ;;  %vm860_vm1 = vweird.f32 %v1219_v35 }
 0x30a   : > { %vm861_vm3 = vmor %vm859_vm2, %vm860_vm1 }
 0x30b   : > { %v856_v38 = vsub.f32 1.0, %v855_v37 }
 0x30d   : > { %v857_v41 = vmul.f32 %v1219_v35, %v856_v38 }
 0x30f   : > { %v858_v43 = vadd.f32 %v1219_v35, %v857_v41 }
 0x311   : > { %v862_v45 = vsel %vm861_vm3, %v1219_v35, %v858_v43 }
 0x312   : > { %v867_v46 = vsel %vm864_vm4, %v866_v44, %v862_v45 }
 0x313   : > { %v868_v47 = vmul.f32 0.9, %v867_v46 }
 0x315   : > { %v869_v48 = vadd.f32 0.1, %v868_v47 }
 0x317   : > { %v873_v49 = vsel %vm872_vm7, %v869_v48, %v846_v30 }
 0x318   : > { %874 = vst [vmem:[%s609_s29] sm:$0xff] %v873_v49 }
 0x319   : > { %1487 = shalt.err (!%p1484_p13)
}
 0x31a   : > { %1109 = dma.vmem_to_hbm [thread:$0]  (%p1744_p2), %s889_s14, 128, %s891_s18, %s876_s2  }
 0x31b PF: > { %s902_s5 = sand.u32 1, %s1542_s25   ;;  %p1138_p0 = pnand %p1060_p4, %p1751_p6 }
 0x31c   : > { %s903_s17 = scalar_lea.sflag [#allocation5], %s902_s5 }
 0x31d   : > { %p1139_p5 = pneg %p1138_p0 }
 0x31f   : > { %1537 = dma.done.wait (%p1139_p5), %s903_s17, 128  }
 0x320   : > { %1539 = vsyncadd (%p1139_p5), %s903_s17, 4294967168  ;;  %s35_s30 = sadd.s32 1, %s1562_s30   ;;  %s1905_s24 = sld [smem:[#allocation25_spill]] }
 0x321   : > { %p32_p7 = scmp.ge.s32.totalorder %s35_s30, 4   ;;  %s1906_s27 = sld [smem:[#allocation29_spill]] }
 0x322   : > { %s1907_s28 = sld [smem:[#allocation27_spill]]  ;;  %s1909_s25 = smov %s1546_s26 }
 0x323   : > { %s1908_s29 = sld [smem:[#allocation28_spill]]  ;;  %34 = sbr.rel (!%p32_p7) target bundleno = 21 (0x15), region = 162 }
 0x326   : > { %s1910_s26 = smov %s1905_s24 }
 0x328   :  { %909 = vsyncpa [#allocation4], 1 }
 0x329   :  { %911 = vsyncpa [#allocation4 + $0x1], 1 }
 0x32a   :  { %912 = vsyncpa [#allocation7], 1 }
 0x32b   :  { %914 = vsyncpa [#allocation7 + $0x1], 1 }
 0x32c   :  { %915 = vsyncpa [#allocation10], 1 }
 0x32d   :  { %916 = vsyncpa [#allocation13], 1 }
 0x32e   :  { %917 = vsyncpa [#allocation16], 1 }
 0x32f   :  { %918 = vsyncpa [#allocation5], 1 }
 0x330   :  { %920 = vsyncpa [#allocation5 + $0x1], 1 }

</bundles_post_ra>
